<compile_context>
chip_gen: v6e
topology: v6e:2x2x1
jax: 0.10.0
libtpu: 0.0.40
codegen_flags: <defaults>
</compile_context>

<pallas_src>
import functools

import jax
import jax.numpy as jnp
from jax.experimental import pallas as pl
from jax.experimental.pallas import tpu as pltpu

LANE = 128


def _round_up(x, m):
    return (x + m - 1) // m * m


def _choose_row_tile(m):
    """Row tile: multiple of 8, <=512, and >=2 grid steps when possible."""
    if m <= 8:
        return m
    tm = min(512, _round_up(m, 16) // 2)   # at least 2 steps -> both v7x TCs busy
    return max(8, (tm // 8) * 8)


# ----------------------------------------------------------------------------
# Pallas kernel: fused chain of (x @ W + b) [+ ReLU] [+ residual] layers
# ----------------------------------------------------------------------------
def _conv_chain_kernel(meta, has_skip, *refs):
    """Fused 1x1-conv chain on one (tm, C) row tile.

    refs = (x_ref, w_0, b_0, ..., w_{L-1}, b_{L-1}, [skip_ref], out_ref)
    meta = tuple of (relu: bool, res) per layer, where res is
           None | "skip" | int i ("add the value produced after layer i",
           i == -1 meaning the kernel input tile).
    """
    n_layers = len(meta)
    x_ref = refs[0]
    wb = refs[1:1 + 2 * n_layers]
    pos = 1 + 2 * n_layers
    skip_ref = refs[pos] if has_skip else None
    out_ref = refs[-1]

    vals = [x_ref[...].astype(jnp.float32)]   # vals[i+1] = output of layer i
    h = vals[0]
    for li, (relu, res) in enumerate(meta):
        wv = wb[2 * li][...]                  # weights resident in VMEM (bf16/f32)
        bv = wb[2 * li + 1][...]              # (1, Cout) f32
        acc = jnp.dot(h.astype(wv.dtype), wv, preferred_element_type=jnp.float32)
        acc = acc + bv.astype(jnp.float32)
        if relu:
            acc = jnp.maximum(acc, 0.0)
        if res == "skip":
            acc = acc + skip_ref[...].astype(jnp.float32)
        elif res is not None:
            acc = acc + vals[res + 1]
        h = acc
        vals.append(h)
    out_ref[...] = h.astype(out_ref.dtype)


def conv_chain(x2d, layers, skip2d=None, *, out_dtype=jnp.float32):
    """Run a fused chain of pointwise layers on a (M, C) activation matrix.

    layers: list of dicts {"w": (Cin_i, Cout_i), "b": (Cout_i,),
                           "relu": bool, "res": None|"skip"|int}.
    skip2d: optional (M, C_skip) matrix consumed by layers with res == "skip".
    """
    m, cin = x2d.shape
    cout = layers[-1]["w"].shape[1]
    tm = _choose_row_tile(m)
    grid = (pl.cdiv(m, tm),)

    in_specs = [pl.BlockSpec((tm, cin), lambda i: (i, 0))]
    operands = [x2d]
    meta = []
    for lyr in layers:
        cin_i, cout_i = lyr["w"].shape
        in_specs.append(pl.BlockSpec((cin_i, cout_i), lambda i: (0, 0)))  # resident
        in_specs.append(pl.BlockSpec((1, cout_i), lambda i: (0, 0)))      # resident
        operands += [lyr["w"], lyr["b"].reshape(1, cout_i)]
        meta.append((bool(lyr.get("relu", False)), lyr.get("res", None)))

    has_skip = skip2d is not None
    if has_skip:
        c_skip = skip2d.shape[1]
        in_specs.append(pl.BlockSpec((tm, c_skip), lambda i: (i, 0)))
        operands.append(skip2d)

    return pl.pallas_call(
        functools.partial(_conv_chain_kernel, tuple(meta), has_skip),
        out_shape=jax.ShapeDtypeStruct((m, cout), out_dtype),
        grid=grid,
        in_specs=in_specs,
        out_specs=pl.BlockSpec((tm, cout), lambda i: (i, 0)),
        compiler_params=pltpu.CompilerParams(
            dimension_semantics=("parallel",),
            vmem_limit_bytes=32 * 1024 * 1024,   # safe on v5e/v6e/v7x
        ),
    )(*operands)


# ----------------------------------------------------------------------------
# Nearest-neighbor resampling glue on (M, C) rows (matches F.interpolate
# default mode='nearest').  Tensors here are tiny (<64 KB); kept as XLA ops.
# TODO(synk): could be folded into the conv kernels' DMA pattern (strided
# pl.ds reads / duplicated row stores) to save a few HBM passes.
# ----------------------------------------------------------------------------
def nearest_half_rows(x2d, n, h, w):
    c = x2d.shape[1]
    x4 = x2d.reshape(n, h, w, c)[:, ::2, ::2, :]
    return x4.reshape(n * (h // 2) * (w // 2), c)


def nearest_double_rows(x2d, n, h, w):
    c = x2d.shape[1]
    x4 = x2d.reshape(n, h, w, c)
    x4 = jnp.repeat(jnp.repeat(x4, 2, axis=1), 2, axis=2)
    return x4.reshape(n * h * 2 * w * 2, c)


# ----------------------------------------------------------------------------
# NETS forward (NHWC / (M, C) end-to-end; one transpose in, one out)
# ----------------------------------------------------------------------------
# TODO(synk): ResidualBlock / DownSamplingBlock / BottomAggBlock /
# UpSamplingAggBlock source was not included in the reference; shape-consistent
# synthetic stand-ins (fused 1x1 conv + ReLU + residual/skip) are used.
def nets_forward(x_nchw, params, *, n_out):
    n, cin, hh, ww = x_nchw.shape
    h2, w2 = hh // 2, ww // 2
    h4, w4 = h2 // 2, w2 // 2
    h8, w8 = h4 // 2, w4 // 2

    # single entry layout change: NCHW -> NHWC, then the initial half-resample
    x = jnp.transpose(x_nchw, (0, 2, 3, 1))        # (N, H, W, Cin)
    x = x[:, ::2, ::2, :]                          # F.interpolate size=(H/2, W/2)
    x2d = x.reshape(n * h2 * w2, cin)

    # stage A: input_block (ResidualBlock) + conv_input fused
    x1 = conv_chain(x2d, [
        dict(w=params["input_block"]["w"], b=params["input_block"]["b"],
             relu=True, res=-1),
        dict(w=params["conv_input"]["w"], b=params["conv_input"]["b"]),
    ])                                             # (N*h2*w2, startC)

    # stage B: down_sample1
    xb = nearest_half_rows(x1, n, h2, w2)
    x2 = conv_chain(xb, [
        dict(w=params["down1"]["w"], b=params["down1"]["b"], relu=True),
    ])                                             # (N*h4*w4, 2*startC)

    # stage C: down_sample2 + bottom (both bottom convs) fused
    xc = nearest_half_rows(x2, n, h4, w4)
    xc = conv_chain(xc, [
        dict(w=params["down2"]["w"], b=params["down2"]["b"], relu=True),
        dict(w=params["bottom"]["w1"], b=params["bottom"]["b1"], relu=True),
        dict(w=params["bottom"]["w2"], b=params["bottom"]["b2"], relu=True, res=0),
    ])                                             # (N*h8*w8, 4*startC)

    # stage D: up_sample1 + "x = x + x2"
    xd = nearest_double_rows(xc, n, h8, w8)
    xd = conv_chain(xd, [
        dict(w=params["up1"]["w"], b=params["up1"]["b"], relu=True, res="skip"),
    ], skip2d=x2)                                  # (N*h4*w4, 2*startC)

    # stage E: up_sample2 + "x = x + x1" + output_block + dropout(eval) +
    #          conv_output (padded to 128 lanes for dense stores), fused
    xe = nearest_double_rows(xd, n, h4, w4)
    xe = conv_chain(xe, [
        dict(w=params["up2"]["w"], b=params["up2"]["b"], relu=True, res="skip"),
        dict(w=params["output_block"]["w"], b=params["output_block"]["b"],
             relu=True, res=0),
        dict(w=params["conv_output"]["w_pad"], b=params["conv_output"]["b_pad"]),
    ], skip2d=x1)                                  # (N*h2*w2, 128) lane-dense

    xe = xe[:, :n_out]                             # drop lane padding
    out4 = xe.reshape(n, h2, w2, n_out)
    out4 = jnp.repeat(jnp.repeat(out4, 2, axis=1), 2, axis=2)   # back to (H, W)
    logit = jnp.transpose(out4, (0, 3, 1, 2))      # single exit transpose
    return {"logit": logit}


# ----------------------------------------------------------------------------
# Deterministic parameter init (weight shapes follow the module's __init__)
# ----------------------------------------------------------------------------
def _init_conv(key, cin, cout):
    kw, kb = jax.random.split(key)
    w = jax.random.normal(kw, (cin, cout), jnp.float32) * (1.0 / jnp.sqrt(cin))
    b = jax.random.normal(kb, (cout,), jnp.float32) * 0.01
    # bf16 weights for the MXU (f32 accumulate); keep the tiny 3-channel
    # layers in f32.
    wdtype = jnp.bfloat16 if cin >= 8 else jnp.float32
    return {"w": w.astype(wdtype), "b": b}


def init_params(key, classN=1, startC=32, inC=3):
    keys = jax.random.split(key, 10)
    bottom1 = _init_conv(keys[4], startC * 4, startC * 2)
    bottom2 = _init_conv(keys[5], startC * 2, startC * 4)
    out_conv = _init_conv(keys[9], startC, classN + 1)
    n_out = classN + 1
    # pad the final conv's Cout up to a full 128-lane tile (dense stores);
    # padding columns are zero and sliced off in the wrapper.
    w_pad = jnp.zeros((startC, LANE), out_conv["w"].dtype).at[:, :n_out].set(out_conv["w"])
    b_pad = jnp.zeros((LANE,), jnp.float32).at[:n_out].set(out_conv["b"])
    return {
        "input_block": _init_conv(keys[0], inC, inC),
        "conv_input": _init_conv(keys[1], inC, startC),
        "down1": _init_conv(keys[2], startC, startC * 2),
        "down2": _init_conv(keys[3], startC * 2, startC * 4),
        "bottom": {"w1": bottom1["w"], "b1": bottom1["b"],
                   "w2": bottom2["w"], "b2": bottom2["b"]},
        "up1": _init_conv(keys[6], startC * 4, startC * 2),
        "up2": _init_conv(keys[7], startC * 2, startC),
        "output_block": _init_conv(keys[8], startC, startC),
        "conv_output": {"w_pad": w_pad, "b_pad": b_pad},
    }


if __name__ == "__main__":
    key = jax.random.PRNGKey(0)
    kx, kp = jax.random.split(key)
    classN = 1
    x = jax.random.normal(kx, (2, 3, 16, 16), jnp.float32)   # NCHW, like PyTorch
    params = init_params(kp, classN=classN, startC=32, inC=3)

    fwd = jax.jit(functools.partial(nets_forward, n_out=classN + 1))
    out = fwd(x, params)
    logit = jax.block_until_ready(out["logit"])
    assert logit.shape == (2, classN + 1, 16, 16), logit.shape
    assert bool(jnp.all(jnp.isfinite(logit)))
    print("KERNEL_OK")
</pallas_src>

<mosaic_0001>
module attributes {stable_mosaic.version = 11 : i64} {
  func.func @_conv_chain_kernel(%arg0: i32, %arg1: memref<8x64xf32, #tpu.memory_space<vmem>>, %arg2: memref<64x128xbf16, #tpu.memory_space<vmem>>, %arg3: memref<1x128xf32, #tpu.memory_space<vmem>>, %arg4: memref<128x64xbf16, #tpu.memory_space<vmem>>, %arg5: memref<1x64xf32, #tpu.memory_space<vmem>>, %arg6: memref<64x128xbf16, #tpu.memory_space<vmem>>, %arg7: memref<1x128xf32, #tpu.memory_space<vmem>>, %arg8: memref<8x128xf32, #tpu.memory_space<vmem>>) attributes {dimension_semantics = [#tpu.dimension_semantics<parallel>], iteration_bounds = array<i64: 1>, scalar_prefetch = 0 : i64, scratch_operands = 0 : i64, tpu.core_type = #tpu.core_type<tc>, window_params = [{transform_indices = @transform_0, window_bounds = array<i64: 8, 64>}, {pipeline_mode = #tpu.pipeline_mode<synchronous>, transform_indices = @transform_1, window_bounds = array<i64: 64, 128>}, {pipeline_mode = #tpu.pipeline_mode<synchronous>, transform_indices = @transform_2, window_bounds = array<i64: 1, 128>}, {pipeline_mode = #tpu.pipeline_mode<synchronous>, transform_indices = @transform_3, window_bounds = array<i64: 128, 64>}, {pipeline_mode = #tpu.pipeline_mode<synchronous>, transform_indices = @transform_4, window_bounds = array<i64: 1, 64>}, {pipeline_mode = #tpu.pipeline_mode<synchronous>, transform_indices = @transform_5, window_bounds = array<i64: 64, 128>}, {pipeline_mode = #tpu.pipeline_mode<synchronous>, transform_indices = @transform_6, window_bounds = array<i64: 1, 128>}, {transform_indices = @transform_7, window_bounds = array<i64: 8, 128>}]} {
    %c0 = arith.constant 0 : index
    %c0_0 = arith.constant 0 : index
    %0 = vector.load %arg1[%c0, %c0_0] : memref<8x64xf32, #tpu.memory_space<vmem>>, vector<8x64xf32>
    %c0_1 = arith.constant 0 : index
    %c0_2 = arith.constant 0 : index
    %1 = vector.load %arg2[%c0_1, %c0_2] : memref<64x128xbf16, #tpu.memory_space<vmem>>, vector<64x128xbf16>
    %c0_3 = arith.constant 0 : index
    %c0_4 = arith.constant 0 : index
    %2 = vector.load %arg3[%c0_3, %c0_4] : memref<1x128xf32, #tpu.memory_space<vmem>>, vector<1x128xf32>
    %3 = arith.truncf %0 : vector<8x64xf32> to vector<8x64xbf16>
    %cst = arith.constant dense<0.000000e+00> : vector<8x128xf32>
    %4 = tpu.matmul %3, %1, %cst {dimension_numbers = #tpu.dot_dimension_numbers<[1], [0], [0], [1], [0, 0, 1, 1], [], []>} : vector<8x64xbf16>, vector<64x128xbf16>, vector<8x128xf32> -> vector<8x128xf32>
    %5 = vector.broadcast %2 : vector<1x128xf32> to vector<8x128xf32>
    %6 = arith.addf %4, %5 : vector<8x128xf32>
    %cst_5 = arith.constant 0.000000e+00 : f32
    %7 = vector.broadcast %cst_5 : f32 to vector<8x128xf32>
    %8 = arith.maximumf %6, %7 : vector<8x128xf32>
    %c0_6 = arith.constant 0 : index
    %c0_7 = arith.constant 0 : index
    %9 = vector.load %arg4[%c0_6, %c0_7] : memref<128x64xbf16, #tpu.memory_space<vmem>>, vector<128x64xbf16>
    %c0_8 = arith.constant 0 : index
    %c0_9 = arith.constant 0 : index
    %10 = vector.load %arg5[%c0_8, %c0_9] : memref<1x64xf32, #tpu.memory_space<vmem>>, vector<1x64xf32>
    %11 = arith.truncf %8 : vector<8x128xf32> to vector<8x128xbf16>
    %cst_10 = arith.constant dense<0.000000e+00> : vector<8x64xf32>
    %12 = tpu.matmul %11, %9, %cst_10 {dimension_numbers = #tpu.dot_dimension_numbers<[1], [0], [0], [1], [0, 0, 1, 1], [], []>} : vector<8x128xbf16>, vector<128x64xbf16>, vector<8x64xf32> -> vector<8x64xf32>
    %13 = vector.broadcast %10 : vector<1x64xf32> to vector<8x64xf32>
    %14 = arith.addf %12, %13 : vector<8x64xf32>
    %cst_11 = arith.constant 0.000000e+00 : f32
    %15 = vector.broadcast %cst_11 : f32 to vector<8x64xf32>
    %16 = arith.maximumf %14, %15 : vector<8x64xf32>
    %c0_12 = arith.constant 0 : index
    %c0_13 = arith.constant 0 : index
    %17 = vector.load %arg6[%c0_12, %c0_13] : memref<64x128xbf16, #tpu.memory_space<vmem>>, vector<64x128xbf16>
    %c0_14 = arith.constant 0 : index
    %c0_15 = arith.constant 0 : index
    %18 = vector.load %arg7[%c0_14, %c0_15] : memref<1x128xf32, #tpu.memory_space<vmem>>, vector<1x128xf32>
    %19 = arith.truncf %16 : vector<8x64xf32> to vector<8x64xbf16>
    %cst_16 = arith.constant dense<0.000000e+00> : vector<8x128xf32>
    %20 = tpu.matmul %19, %17, %cst_16 {dimension_numbers = #tpu.dot_dimension_numbers<[1], [0], [0], [1], [0, 0, 1, 1], [], []>} : vector<8x64xbf16>, vector<64x128xbf16>, vector<8x128xf32> -> vector<8x128xf32>
    %21 = vector.broadcast %18 : vector<1x128xf32> to vector<8x128xf32>
    %22 = arith.addf %20, %21 : vector<8x128xf32>
    %cst_17 = arith.constant 0.000000e+00 : f32
    %23 = vector.broadcast %cst_17 : f32 to vector<8x128xf32>
    %24 = arith.maximumf %22, %23 : vector<8x128xf32>
    %25 = arith.addf %24, %8 : vector<8x128xf32>
    %c0_18 = arith.constant 0 : index
    %c0_19 = arith.constant 0 : index
    %26 = vector.load %arg8[%c0_18, %c0_19] : memref<8x128xf32, #tpu.memory_space<vmem>>, vector<8x128xf32>
    tpu.vector_store %arg8[%c0_18, %c0_19], %25 {strides = array<i32>} : memref<8x128xf32, #tpu.memory_space<vmem>>, vector<8x128xf32>,
    return
  }
  func.func @transform_0(%arg0: i32) -> (i32, i32) {
    %c0_i32 = arith.constant 0 : i32
    %c0_i32_0 = arith.constant 0 : i32
    return %arg0, %c0_i32 : i32, i32
  }
  func.func @transform_1(%arg0: i32) -> (i32, i32) {
    %c0_i32 = arith.constant 0 : i32
    %c0_i32_0 = arith.constant 0 : i32
    %c0_i32_1 = arith.constant 0 : i32
    return %c0_i32, %c0_i32_0 : i32, i32
  }
  func.func @transform_2(%arg0: i32) -> (i32, i32) {
    %c0_i32 = arith.constant 0 : i32
    %c0_i32_0 = arith.constant 0 : i32
    %c0_i32_1 = arith.constant 0 : i32
    return %c0_i32, %c0_i32_0 : i32, i32
  }
  func.func @transform_3(%arg0: i32) -> (i32, i32) {
    %c0_i32 = arith.constant 0 : i32
    %c0_i32_0 = arith.constant 0 : i32
    %c0_i32_1 = arith.constant 0 : i32
    return %c0_i32, %c0_i32_0 : i32, i32
  }
  func.func @transform_4(%arg0: i32) -> (i32, i32) {
    %c0_i32 = arith.constant 0 : i32
    %c0_i32_0 = arith.constant 0 : i32
    %c0_i32_1 = arith.constant 0 : i32
    return %c0_i32, %c0_i32_0 : i32, i32
  }
  func.func @transform_5(%arg0: i32) -> (i32, i32) {
    %c0_i32 = arith.constant 0 : i32
    %c0_i32_0 = arith.constant 0 : i32
    %c0_i32_1 = arith.constant 0 : i32
    return %c0_i32, %c0_i32_0 : i32, i32
  }
  func.func @transform_6(%arg0: i32) -> (i32, i32) {
    %c0_i32 = arith.constant 0 : i32
    %c0_i32_0 = arith.constant 0 : i32
    %c0_i32_1 = arith.constant 0 : i32
    return %c0_i32, %c0_i32_0 : i32, i32
  }
  func.func @transform_7(%arg0: i32) -> (i32, i32) {
    %c0_i32 = arith.constant 0 : i32
    %c0_i32_0 = arith.constant 0 : i32
    return %arg0, %c0_i32 : i32, i32
  }
}

module attributes {stable_mosaic.version = 11 : i64} {
  func.func @_conv_chain_kernel(%arg0: i32, %arg1: memref<64x3xf32, #tpu.memory_space<vmem>>, %arg2: memref<3x3xf32, #tpu.memory_space<vmem>>, %arg3: memref<1x3xf32, #tpu.memory_space<vmem>>, %arg4: memref<3x32xf32, #tpu.memory_space<vmem>>, %arg5: memref<1x32xf32, #tpu.memory_space<vmem>>, %arg6: memref<64x32xf32, #tpu.memory_space<vmem>>) attributes {dimension_semantics = [#tpu.dimension_semantics<parallel>], iteration_bounds = array<i64: 2>, scalar_prefetch = 0 : i64, scratch_operands = 0 : i64, tpu.core_type = #tpu.core_type<tc>, window_params = [{transform_indices = @transform_0, window_bounds = array<i64: 64, 3>}, {pipeline_mode = #tpu.pipeline_mode<synchronous>, transform_indices = @transform_1, window_bounds = array<i64: 3, 3>}, {pipeline_mode = #tpu.pipeline_mode<synchronous>, transform_indices = @transform_2, window_bounds = array<i64: 1, 3>}, {pipeline_mode = #tpu.pipeline_mode<synchronous>, transform_indices = @transform_3, window_bounds = array<i64: 3, 32>}, {pipeline_mode = #tpu.pipeline_mode<synchronous>, transform_indices = @transform_4, window_bounds = array<i64: 1, 32>}, {transform_indices = @transform_5, window_bounds = array<i64: 64, 32>}]} {
    %c0 = arith.constant 0 : index
    %c0_0 = arith.constant 0 : index
    %0 = vector.load %arg1[%c0, %c0_0] : memref<64x3xf32, #tpu.memory_space<vmem>>, vector<64x3xf32>
    %c0_1 = arith.constant 0 : index
    %c0_2 = arith.constant 0 : index
    %1 = vector.load %arg2[%c0_1, %c0_2] : memref<3x3xf32, #tpu.memory_space<vmem>>, vector<3x3xf32>
    %c0_3 = arith.constant 0 : index
    %c0_4 = arith.constant 0 : index
    %2 = vector.load %arg3[%c0_3, %c0_4] : memref<1x3xf32, #tpu.memory_space<vmem>>, vector<1x3xf32>
    %cst = arith.constant dense<0.000000e+00> : vector<64x3xf32>
    %3 = tpu.matmul %0, %1, %cst {dimension_numbers = #tpu.dot_dimension_numbers<[1], [0], [0], [1], [0, 0, 1, 1], [], []>} : vector<64x3xf32>, vector<3x3xf32>, vector<64x3xf32> -> vector<64x3xf32>
    %4 = vector.broadcast %2 : vector<1x3xf32> to vector<64x3xf32>
    %5 = arith.addf %3, %4 : vector<64x3xf32>
    %cst_5 = arith.constant 0.000000e+00 : f32
    %6 = vector.broadcast %cst_5 : f32 to vector<64x3xf32>
    %7 = arith.maximumf %5, %6 : vector<64x3xf32>
    %8 = arith.addf %7, %0 : vector<64x3xf32>
    %c0_6 = arith.constant 0 : index
    %c0_7 = arith.constant 0 : index
    %9 = vector.load %arg4[%c0_6, %c0_7] : memref<3x32xf32, #tpu.memory_space<vmem>>, vector<3x32xf32>
    %c0_8 = arith.constant 0 : index
    %c0_9 = arith.constant 0 : index
    %10 = vector.load %arg5[%c0_8, %c0_9] : memref<1x32xf32, #tpu.memory_space<vmem>>, vector<1x32xf32>
    %cst_10 = arith.constant dense<0.000000e+00> : vector<64x32xf32>
    %11 = tpu.matmul %8, %9, %cst_10 {dimension_numbers = #tpu.dot_dimension_numbers<[1], [0], [0], [1], [0, 0, 1, 1], [], []>} : vector<64x3xf32>, vector<3x32xf32>, vector<64x32xf32> -> vector<64x32xf32>
    %12 = vector.broadcast %10 : vector<1x32xf32> to vector<64x32xf32>
    %13 = arith.addf %11, %12 : vector<64x32xf32>
    %c0_11 = arith.constant 0 : index
    %c0_12 = arith.constant 0 : index
    %14 = vector.load %arg6[%c0_11, %c0_12] : memref<64x32xf32, #tpu.memory_space<vmem>>, vector<64x32xf32>
    tpu.vector_store %arg6[%c0_11, %c0_12], %13 {strides = array<i32>} : memref<64x32xf32, #tpu.memory_space<vmem>>, vector<64x32xf32>,
    return
  }
  func.func @transform_0(%arg0: i32) -> (i32, i32) {
    %c0_i32 = arith.constant 0 : i32
    %c0_i32_0 = arith.constant 0 : i32
    return %arg0, %c0_i32 : i32, i32
  }
  func.func @transform_1(%arg0: i32) -> (i32, i32) {
    %c0_i32 = arith.constant 0 : i32
    %c0_i32_0 = arith.constant 0 : i32
    %c0_i32_1 = arith.constant 0 : i32
    return %c0_i32, %c0_i32_0 : i32, i32
  }
  func.func @transform_2(%arg0: i32) -> (i32, i32) {
    %c0_i32 = arith.constant 0 : i32
    %c0_i32_0 = arith.constant 0 : i32
    %c0_i32_1 = arith.constant 0 : i32
    return %c0_i32, %c0_i32_0 : i32, i32
  }
  func.func @transform_3(%arg0: i32) -> (i32, i32) {
    %c0_i32 = arith.constant 0 : i32
    %c0_i32_0 = arith.constant 0 : i32
    %c0_i32_1 = arith.constant 0 : i32
    return %c0_i32, %c0_i32_0 : i32, i32
  }
  func.func @transform_4(%arg0: i32) -> (i32, i32) {
    %c0_i32 = arith.constant 0 : i32
    %c0_i32_0 = arith.constant 0 : i32
    %c0_i32_1 = arith.constant 0 : i32
    return %c0_i32, %c0_i32_0 : i32, i32
  }
  func.func @transform_5(%arg0: i32) -> (i32, i32) {
    %c0_i32 = arith.constant 0 : i32
    %c0_i32_0 = arith.constant 0 : i32
    return %arg0, %c0_i32 : i32, i32
  }
}

module attributes {stable_mosaic.version = 11 : i64} {
  func.func @_conv_chain_kernel(%arg0: i32, %arg1: memref<16x32xf32, #tpu.memory_space<vmem>>, %arg2: memref<32x64xbf16, #tpu.memory_space<vmem>>, %arg3: memref<1x64xf32, #tpu.memory_space<vmem>>, %arg4: memref<16x64xf32, #tpu.memory_space<vmem>>) attributes {dimension_semantics = [#tpu.dimension_semantics<parallel>], iteration_bounds = array<i64: 2>, scalar_prefetch = 0 : i64, scratch_operands = 0 : i64, tpu.core_type = #tpu.core_type<tc>, window_params = [{transform_indices = @transform_0, window_bounds = array<i64: 16, 32>}, {pipeline_mode = #tpu.pipeline_mode<synchronous>, transform_indices = @transform_1, window_bounds = array<i64: 32, 64>}, {pipeline_mode = #tpu.pipeline_mode<synchronous>, transform_indices = @transform_2, window_bounds = array<i64: 1, 64>}, {transform_indices = @transform_3, window_bounds = array<i64: 16, 64>}]} {
    %c0 = arith.constant 0 : index
    %c0_0 = arith.constant 0 : index
    %0 = vector.load %arg1[%c0, %c0_0] : memref<16x32xf32, #tpu.memory_space<vmem>>, vector<16x32xf32>
    %c0_1 = arith.constant 0 : index
    %c0_2 = arith.constant 0 : index
    %1 = vector.load %arg2[%c0_1, %c0_2] : memref<32x64xbf16, #tpu.memory_space<vmem>>, vector<32x64xbf16>
    %c0_3 = arith.constant 0 : index
    %c0_4 = arith.constant 0 : index
    %2 = vector.load %arg3[%c0_3, %c0_4] : memref<1x64xf32, #tpu.memory_space<vmem>>, vector<1x64xf32>
    %3 = arith.truncf %0 : vector<16x32xf32> to vector<16x32xbf16>
    %cst = arith.constant dense<0.000000e+00> : vector<16x64xf32>
    %4 = tpu.matmul %3, %1, %cst {dimension_numbers = #tpu.dot_dimension_numbers<[1], [0], [0], [1], [0, 0, 1, 1], [], []>} : vector<16x32xbf16>, vector<32x64xbf16>, vector<16x64xf32> -> vector<16x64xf32>
    %5 = vector.broadcast %2 : vector<1x64xf32> to vector<16x64xf32>
    %6 = arith.addf %4, %5 : vector<16x64xf32>
    %cst_5 = arith.constant 0.000000e+00 : f32
    %7 = vector.broadcast %cst_5 : f32 to vector<16x64xf32>
    %8 = arith.maximumf %6, %7 : vector<16x64xf32>
    %c0_6 = arith.constant 0 : index
    %c0_7 = arith.constant 0 : index
    %9 = vector.load %arg4[%c0_6, %c0_7] : memref<16x64xf32, #tpu.memory_space<vmem>>, vector<16x64xf32>
    tpu.vector_store %arg4[%c0_6, %c0_7], %8 {strides = array<i32>} : memref<16x64xf32, #tpu.memory_space<vmem>>, vector<16x64xf32>,
    return
  }
  func.func @transform_0(%arg0: i32) -> (i32, i32) {
    %c0_i32 = arith.constant 0 : i32
    %c0_i32_0 = arith.constant 0 : i32
    return %arg0, %c0_i32 : i32, i32
  }
  func.func @transform_1(%arg0: i32) -> (i32, i32) {
    %c0_i32 = arith.constant 0 : i32
    %c0_i32_0 = arith.constant 0 : i32
    %c0_i32_1 = arith.constant 0 : i32
    return %c0_i32, %c0_i32_0 : i32, i32
  }
  func.func @transform_2(%arg0: i32) -> (i32, i32) {
    %c0_i32 = arith.constant 0 : i32
    %c0_i32_0 = arith.constant 0 : i32
    %c0_i32_1 = arith.constant 0 : i32
    return %c0_i32, %c0_i32_0 : i32, i32
  }
  func.func @transform_3(%arg0: i32) -> (i32, i32) {
    %c0_i32 = arith.constant 0 : i32
    %c0_i32_0 = arith.constant 0 : i32
    return %arg0, %c0_i32 : i32, i32
  }
}

module attributes {stable_mosaic.version = 11 : i64} {
  func.func @_conv_chain_kernel(%arg0: i32, %arg1: memref<16x128xf32, #tpu.memory_space<vmem>>, %arg2: memref<128x64xbf16, #tpu.memory_space<vmem>>, %arg3: memref<1x64xf32, #tpu.memory_space<vmem>>, %arg4: memref<16x64xf32, #tpu.memory_space<vmem>>, %arg5: memref<16x64xf32, #tpu.memory_space<vmem>>) attributes {dimension_semantics = [#tpu.dimension_semantics<parallel>], iteration_bounds = array<i64: 2>, scalar_prefetch = 0 : i64, scratch_operands = 0 : i64, tpu.core_type = #tpu.core_type<tc>, window_params = [{transform_indices = @transform_0, window_bounds = array<i64: 16, 128>}, {pipeline_mode = #tpu.pipeline_mode<synchronous>, transform_indices = @transform_1, window_bounds = array<i64: 128, 64>}, {pipeline_mode = #tpu.pipeline_mode<synchronous>, transform_indices = @transform_2, window_bounds = array<i64: 1, 64>}, {transform_indices = @transform_3, window_bounds = array<i64: 16, 64>}, {transform_indices = @transform_4, window_bounds = array<i64: 16, 64>}]} {
    %c0 = arith.constant 0 : index
    %c0_0 = arith.constant 0 : index
    %0 = vector.load %arg1[%c0, %c0_0] : memref<16x128xf32, #tpu.memory_space<vmem>>, vector<16x128xf32>
    %c0_1 = arith.constant 0 : index
    %c0_2 = arith.constant 0 : index
    %1 = vector.load %arg2[%c0_1, %c0_2] : memref<128x64xbf16, #tpu.memory_space<vmem>>, vector<128x64xbf16>
    %c0_3 = arith.constant 0 : index
    %c0_4 = arith.constant 0 : index
    %2 = vector.load %arg3[%c0_3, %c0_4] : memref<1x64xf32, #tpu.memory_space<vmem>>, vector<1x64xf32>
    %3 = arith.truncf %0 : vector<16x128xf32> to vector<16x128xbf16>
    %cst = arith.constant dense<0.000000e+00> : vector<16x64xf32>
    %4 = tpu.matmul %3, %1, %cst {dimension_numbers = #tpu.dot_dimension_numbers<[1], [0], [0], [1], [0, 0, 1, 1], [], []>} : vector<16x128xbf16>, vector<128x64xbf16>, vector<16x64xf32> -> vector<16x64xf32>
    %5 = vector.broadcast %2 : vector<1x64xf32> to vector<16x64xf32>
    %6 = arith.addf %4, %5 : vector<16x64xf32>
    %cst_5 = arith.constant 0.000000e+00 : f32
    %7 = vector.broadcast %cst_5 : f32 to vector<16x64xf32>
    %8 = arith.maximumf %6, %7 : vector<16x64xf32>
    %c0_6 = arith.constant 0 : index
    %c0_7 = arith.constant 0 : index
    %9 = vector.load %arg4[%c0_6, %c0_7] : memref<16x64xf32, #tpu.memory_space<vmem>>, vector<16x64xf32>
    %10 = arith.addf %8, %9 : vector<16x64xf32>
    %c0_8 = arith.constant 0 : index
    %c0_9 = arith.constant 0 : index
    %11 = vector.load %arg5[%c0_8, %c0_9] : memref<16x64xf32, #tpu.memory_space<vmem>>, vector<16x64xf32>
    tpu.vector_store %arg5[%c0_8, %c0_9], %10 {strides = array<i32>} : memref<16x64xf32, #tpu.memory_space<vmem>>, vector<16x64xf32>,
    return
  }
  func.func @transform_0(%arg0: i32) -> (i32, i32) {
    %c0_i32 = arith.constant 0 : i32
    %c0_i32_0 = arith.constant 0 : i32
    return %arg0, %c0_i32 : i32, i32
  }
  func.func @transform_1(%arg0: i32) -> (i32, i32) {
    %c0_i32 = arith.constant 0 : i32
    %c0_i32_0 = arith.constant 0 : i32
    %c0_i32_1 = arith.constant 0 : i32
    return %c0_i32, %c0_i32_0 : i32, i32
  }
  func.func @transform_2(%arg0: i32) -> (i32, i32) {
    %c0_i32 = arith.constant 0 : i32
    %c0_i32_0 = arith.constant 0 : i32
    %c0_i32_1 = arith.constant 0 : i32
    return %c0_i32, %c0_i32_0 : i32, i32
  }
  func.func @transform_3(%arg0: i32) -> (i32, i32) {
    %c0_i32 = arith.constant 0 : i32
    %c0_i32_0 = arith.constant 0 : i32
    return %arg0, %c0_i32 : i32, i32
  }
  func.func @transform_4(%arg0: i32) -> (i32, i32) {
    %c0_i32 = arith.constant 0 : i32
    %c0_i32_0 = arith.constant 0 : i32
    return %arg0, %c0_i32 : i32, i32
  }
}

module attributes {stable_mosaic.version = 11 : i64} {
  func.func @_conv_chain_kernel(%arg0: i32, %arg1: memref<64x64xf32, #tpu.memory_space<vmem>>, %arg2: memref<64x32xbf16, #tpu.memory_space<vmem>>, %arg3: memref<1x32xf32, #tpu.memory_space<vmem>>, %arg4: memref<32x32xbf16, #tpu.memory_space<vmem>>, %arg5: memref<1x32xf32, #tpu.memory_space<vmem>>, %arg6: memref<32x128xbf16, #tpu.memory_space<vmem>>, %arg7: memref<1x128xf32, #tpu.memory_space<vmem>>, %arg8: memref<64x32xf32, #tpu.memory_space<vmem>>, %arg9: memref<64x128xf32, #tpu.memory_space<vmem>>) attributes {dimension_semantics = [#tpu.dimension_semantics<parallel>], iteration_bounds = array<i64: 2>, scalar_prefetch = 0 : i64, scratch_operands = 0 : i64, tpu.core_type = #tpu.core_type<tc>, window_params = [{transform_indices = @transform_0, window_bounds = array<i64: 64, 64>}, {pipeline_mode = #tpu.pipeline_mode<synchronous>, transform_indices = @transform_1, window_bounds = array<i64: 64, 32>}, {pipeline_mode = #tpu.pipeline_mode<synchronous>, transform_indices = @transform_2, window_bounds = array<i64: 1, 32>}, {pipeline_mode = #tpu.pipeline_mode<synchronous>, transform_indices = @transform_3, window_bounds = array<i64: 32, 32>}, {pipeline_mode = #tpu.pipeline_mode<synchronous>, transform_indices = @transform_4, window_bounds = array<i64: 1, 32>}, {pipeline_mode = #tpu.pipeline_mode<synchronous>, transform_indices = @transform_5, window_bounds = array<i64: 32, 128>}, {pipeline_mode = #tpu.pipeline_mode<synchronous>, transform_indices = @transform_6, window_bounds = array<i64: 1, 128>}, {transform_indices = @transform_7, window_bounds = array<i64: 64, 32>}, {transform_indices = @transform_8, window_bounds = array<i64: 64, 128>}]} {
    %c0 = arith.constant 0 : index
    %c0_0 = arith.constant 0 : index
    %0 = vector.load %arg1[%c0, %c0_0] : memref<64x64xf32, #tpu.memory_space<vmem>>, vector<64x64xf32>
    %c0_1 = arith.constant 0 : index
    %c0_2 = arith.constant 0 : index
    %1 = vector.load %arg2[%c0_1, %c0_2] : memref<64x32xbf16, #tpu.memory_space<vmem>>, vector<64x32xbf16>
    %c0_3 = arith.constant 0 : index
    %c0_4 = arith.constant 0 : index
    %2 = vector.load %arg3[%c0_3, %c0_4] : memref<1x32xf32, #tpu.memory_space<vmem>>, vector<1x32xf32>
    %3 = arith.truncf %0 : vector<64x64xf32> to vector<64x64xbf16>
    %cst = arith.constant dense<0.000000e+00> : vector<64x32xf32>
    %4 = tpu.matmul %3, %1, %cst {dimension_numbers = #tpu.dot_dimension_numbers<[1], [0], [0], [1], [0, 0, 1, 1], [], []>} : vector<64x64xbf16>, vector<64x32xbf16>, vector<64x32xf32> -> vector<64x32xf32>
    %5 = vector.broadcast %2 : vector<1x32xf32> to vector<64x32xf32>
    %6 = arith.addf %4, %5 : vector<64x32xf32>
    %cst_5 = arith.constant 0.000000e+00 : f32
    %7 = vector.broadcast %cst_5 : f32 to vector<64x32xf32>
    %8 = arith.maximumf %6, %7 : vector<64x32xf32>
    %c0_6 = arith.constant 0 : index
    %c0_7 = arith.constant 0 : index
    %9 = vector.load %arg8[%c0_6, %c0_7] : memref<64x32xf32, #tpu.memory_space<vmem>>, vector<64x32xf32>
    %10 = arith.addf %8, %9 : vector<64x32xf32>
    %c0_8 = arith.constant 0 : index
    %c0_9 = arith.constant 0 : index
    %11 = vector.load %arg4[%c0_8, %c0_9] : memref<32x32xbf16, #tpu.memory_space<vmem>>, vector<32x32xbf16>
    %c0_10 = arith.constant 0 : index
    %c0_11 = arith.constant 0 : index
    %12 = vector.load %arg5[%c0_10, %c0_11] : memref<1x32xf32, #tpu.memory_space<vmem>>, vector<1x32xf32>
    %13 = arith.truncf %10 : vector<64x32xf32> to vector<64x32xbf16>
    %cst_12 = arith.constant dense<0.000000e+00> : vector<64x32xf32>
    %14 = tpu.matmul %13, %11, %cst_12 {dimension_numbers = #tpu.dot_dimension_numbers<[1], [0], [0], [1], [0, 0, 1, 1], [], []>} : vector<64x32xbf16>, vector<32x32xbf16>, vector<64x32xf32> -> vector<64x32xf32>
    %15 = vector.broadcast %12 : vector<1x32xf32> to vector<64x32xf32>
    %16 = arith.addf %14, %15 : vector<64x32xf32>
    %cst_13 = arith.constant 0.000000e+00 : f32
    %17 = vector.broadcast %cst_13 : f32 to vector<64x32xf32>
    %18 = arith.maximumf %16, %17 : vector<64x32xf32>
    %19 = arith.addf %18, %10 : vector<64x32xf32>
    %c0_14 = arith.constant 0 : index
    %c0_15 = arith.constant 0 : index
    %20 = vector.load %arg6[%c0_14, %c0_15] : memref<32x128xbf16, #tpu.memory_space<vmem>>, vector<32x128xbf16>
    %c0_16 = arith.constant 0 : index
    %c0_17 = arith.constant 0 : index
    %21 = vector.load %arg7[%c0_16, %c0_17] : memref<1x128xf32, #tpu.memory_space<vmem>>, vector<1x128xf32>
    %22 = arith.truncf %19 : vector<64x32xf32> to vector<64x32xbf16>
    %cst_18 = arith.constant dense<0.000000e+00> : vector<64x128xf32>
    %23 = tpu.matmul %22, %20, %cst_18 {dimension_numbers = #tpu.dot_dimension_numbers<[1], [0], [0], [1], [0, 0, 1, 1], [], []>} : vector<64x32xbf16>, vector<32x128xbf16>, vector<64x128xf32> -> vector<64x128xf32>
    %24 = vector.broadcast %21 : vector<1x128xf32> to vector<64x128xf32>
    %25 = arith.addf %23, %24 : vector<64x128xf32>
    %c0_19 = arith.constant 0 : index
    %c0_20 = arith.constant 0 : index
    %26 = vector.load %arg9[%c0_19, %c0_20] : memref<64x128xf32, #tpu.memory_space<vmem>>, vector<64x128xf32>
    tpu.vector_store %arg9[%c0_19, %c0_20], %25 {strides = array<i32>} : memref<64x128xf32, #tpu.memory_space<vmem>>, vector<64x128xf32>,
    return
  }
  func.func @transform_0(%arg0: i32) -> (i32, i32) {
    %c0_i32 = arith.constant 0 : i32
    %c0_i32_0 = arith.constant 0 : i32
    return %arg0, %c0_i32 : i32, i32
  }
  func.func @transform_1(%arg0: i32) -> (i32, i32) {
    %c0_i32 = arith.constant 0 : i32
    %c0_i32_0 = arith.constant 0 : i32
    %c0_i32_1 = arith.constant 0 : i32
    return %c0_i32, %c0_i32_0 : i32, i32
  }
  func.func @transform_2(%arg0: i32) -> (i32, i32) {
    %c0_i32 = arith.constant 0 : i32
    %c0_i32_0 = arith.constant 0 : i32
    %c0_i32_1 = arith.constant 0 : i32
    return %c0_i32, %c0_i32_0 : i32, i32
  }
  func.func @transform_3(%arg0: i32) -> (i32, i32) {
    %c0_i32 = arith.constant 0 : i32
    %c0_i32_0 = arith.constant 0 : i32
    %c0_i32_1 = arith.constant 0 : i32
    return %c0_i32, %c0_i32_0 : i32, i32
  }
  func.func @transform_4(%arg0: i32) -> (i32, i32) {
    %c0_i32 = arith.constant 0 : i32
    %c0_i32_0 = arith.constant 0 : i32
    %c0_i32_1 = arith.constant 0 : i32
    return %c0_i32, %c0_i32_0 : i32, i32
  }
  func.func @transform_5(%arg0: i32) -> (i32, i32) {
    %c0_i32 = arith.constant 0 : i32
    %c0_i32_0 = arith.constant 0 : i32
    %c0_i32_1 = arith.constant 0 : i32
    return %c0_i32, %c0_i32_0 : i32, i32
  }
  func.func @transform_6(%arg0: i32) -> (i32, i32) {
    %c0_i32 = arith.constant 0 : i32
    %c0_i32_0 = arith.constant 0 : i32
    %c0_i32_1 = arith.constant 0 : i32
    return %c0_i32, %c0_i32_0 : i32, i32
  }
  func.func @transform_7(%arg0: i32) -> (i32, i32) {
    %c0_i32 = arith.constant 0 : i32
    %c0_i32_0 = arith.constant 0 : i32
    return %arg0, %c0_i32 : i32, i32
  }
  func.func @transform_8(%arg0: i32) -> (i32, i32) {
    %c0_i32 = arith.constant 0 : i32
    %c0_i32_0 = arith.constant 0 : i32
    return %arg0, %c0_i32 : i32, i32
  }
}

</mosaic_0001>

<bundles_post_ra>
// kernel: nets_forward.6
= control target key start
LH: loop header
LB: loop body
LE: loop exit
PB: predicated region body
PF: predicated region fallthrough
CT: control target
= control target key end

     0   :  { %s375_s12 = smov 0   ;;  %s401_s0 = inlined_call_operand.vmem [shape: f32[32,32], index: 0, kind: input, shape index: {}]   ;;  %s402_s1 = inlined_call_operand.vmem [shape: bf16[32,64], index: 1, kind: input, shape index: {}]   ;;  %s403_s2 = inlined_call_operand.vmem [shape: f32[1,64], index: 2, kind: input, shape index: {}]   ;;  %s404_s3 = inlined_call_operand.vmem [shape: f32[32,64], index: 3, kind: output, shape index: {}]  }
   0x1 LB: > { %s307_s13 = sadd.s32 4294967295, %s351_s12   ;;  %p311_p0 = scmp.ge.s32.totalorder %s351_s12, 1  ;;  %s351_s12 = sphi %s375_s12, %s13_s12  }
   0x2   : > { %p138_p1 = scmp.lt.s32.totalorder %s351_s12, 3 }
   0x4   : > { %p139_p2 = pnand %p311_p0, %p138_p1 }
   0x5   : > { %s312_s18 = sshll.u32 (!%p139_p2), %s307_s13, 1 }
   0x6   : > { %142 = sbr.rel (%p139_p2) target bundleno = 222 (0xde), region = 32  ;;  %p163_p3 = scmp.lt.s32.totalorder (!%p139_p2), %s312_s18, 3 }
   0xb   : > { %v343_v0 = vld [vmem:[%s402_s1 + $0x8] sm:$0xff]   ;;  %v353_v1 = vmov 0.0   ;;  %v344_v2 = vld [vmem:[%s402_s1] sm:$0xff]   ;;  %vm354_vm0 = vmmov 0   ;;  %s406_s18 = smov (!%p163_p3, %s312_s18), 3  ;;  %vm201_vm1 = vcmask 261120  }
   0xc   : > { %325 = vmatprep.subr.bf16.mxu0 %v353_v1  ;;  %329 = vmatprep.mubr.msk.bf16.mxu0 %vm354_vm0, %v353_v1  ;;  %s313_s19 = sshll.u32 %s406_s18, 3  ;;  %v316_v6 = vld [vmem:[%s403_s2] ss:$0 sm:$0xff]  ;;  %vm248_vm2 = vcmask 523264  }
   0xd   : > { %326 = vmatpush3.bf16.msra.mxu0 %v343_v0  ;;  %s166_s22 = scalar_lea.vmem %s401_s0, %s313_s19  ;;  %s172_s27 = scalar_lea.vmem %s404_s3, %s313_s19 }
   0xe   : > { %327 = vmatprep.subr.bf16.mxu0 %v353_v1  ;;  %v175_v3 = vld [vmem:[%s166_s22] sm:$0xff]  ;;  %v176_v4 = vld [vmem:[%s166_s22 + $0x8] sm:$0xff] }
   0xf   : > { %v182_v5 = vpack.c.bf16 %v176_v4, %v175_v3 }
  0x11   : > { %328 = vmatpush3.bf16.msra.mxu0 %v344_v2 }
  0x14   : > { %330 = vmatmul.mubr.msk.bf16.vlgmr.msra.gmra.mxu0 %vm201_vm1, %v182_v5 }
  0xd4   : > { %v239_v7 = vpop.f32.mrf.mxu0 }
  0xd5   : > { %v240_v8 = vadd.f32 %v316_v6, %v239_v7 }
  0xd6   : > { %v331_v9 = vpop.f32.mrf.mxu0 }
  0xd7   : > { %v246_v10 = vmax.f32 %v240_v8, 0.0 }
  0xd8   : > { %v242_v11 = vpop.f32.mrf.mxu0 }
  0xd9   : > { %249 = vst.msk [vmem:[%s172_s27] sm:$0xff] %vm248_vm2, %v246_v10  ;;  %v243_v12 = vadd.f32 %v316_v6, %v242_v11 }
  0xda   : > { %v332_v13 = vpop.f32.mrf.mxu0 }
  0xdb   : > { %v247_v14 = vmax.f32 %v243_v12, 0.0 }
  0xdd   : > { %250 = vst.msk [vmem:[%s172_s27 + $0x8] sm:$0xff] %vm248_vm2, %v247_v14 }
  0xde PF: > { %s13_s12 = sadd.s32 1, %s351_s12  }
  0xdf   : > { %p10_p4 = scmp.ge.s32.totalorder %s13_s12, 4  }
  0xe1   :  { %12 = sbr.rel (!%p10_p4) target bundleno = 1 (0x1), region = 62 }

// kernel: nets_forward.7
= control target key start
LH: loop header
LB: loop body
LE: loop exit
PB: predicated region body
PF: predicated region fallthrough
CT: control target
= control target key end

     0   :  { %v418_v0 = vmov 0.0   ;;  %vm419_vm0 = vmmov 0   ;;  %vm68_vm1 = vcmask 523264   ;;  %s547_s1 = inlined_call_operand.vmem [shape: bf16[64,128], index: 1, kind: input, shape index: {}]   ;;  %s548_s3 = inlined_call_operand.vmem [shape: bf16[128,64], index: 3, kind: input, shape index: {}]   ;;  %s549_s0 = inlined_call_operand.vmem [shape: f32[8,64], index: 0, kind: input, shape index: {}]   ;;  %s550_s5 = inlined_call_operand.vmem [shape: bf16[64,128], index: 5, kind: input, shape index: {}]   ;;  %s551_s2 = inlined_call_operand.vmem [shape: f32[1,128], index: 2, kind: input, shape index: {}]   ;;  %s552_s4 = inlined_call_operand.vmem [shape: f32[1,64], index: 4, kind: input, shape index: {}]   ;;  %s553_s6 = inlined_call_operand.vmem [shape: f32[1,128], index: 6, kind: input, shape index: {}]   ;;  %s554_s7 = inlined_call_operand.vmem [shape: f32[8,128], index: 7, kind: output, shape index: {}]  }
   0x1   :  { %356 = vmatprep.subr.bf16.mxu0 %v418_v0  ;;  %v402_v1 = vld [vmem:[%s547_s1 + $0x18] sm:$0xff]   ;;  %364 = vmatprep.mubr.msk.bf16.mxu0 %vm419_vm0, %v418_v0  ;;  %v403_v2 = vld [vmem:[%s547_s1 + $0x10] sm:$0xff]   ;;  %v404_v4 = vld [vmem:[%s547_s1 + $0x8] sm:$0xff]  }
   0x2   :  { %368 = vmatprep.subr.bf16.mxu1 %v418_v0  ;;  %384 = vmatprep.mubr.msk.bf16.mxu1 %vm419_vm0, %v418_v0  ;;  %v406_v3 = vld [vmem:[%s548_s3 + $0x38] sm:$0xff]   ;;  %v407_v5 = vld [vmem:[%s548_s3 + $0x30] sm:$0xff]   ;;  %v405_v6 = vld [vmem:[%s547_s1] sm:$0xff]  }
   0x3   :  { %357 = vmatpush3.bf16.msra.mxu0 %v402_v1  ;;  %369 = vmatpush3.bf16.msra.mxu1 %v406_v3  ;;  %v27_v7 = vld [vmem:[%s549_s0] sm:$0xff]  ;;  %v408_v8 = vld [vmem:[%s548_s3 + $0x28] sm:$0xff]   ;;  %v410_v11 = vld [vmem:[%s548_s3 + $0x18] sm:$0xff]  }
   0x4   :  { %358 = vmatprep.subr.bf16.mxu0 %v418_v0  ;;  %370 = vmatprep.subr.bf16.mxu1 %v418_v0  ;;  %v37_v9 = vpack.c.bf16 %v27_v7, %v27_v7  ;;  %v409_v10 = vld [vmem:[%s548_s3 + $0x20] sm:$0xff]   ;;  %v411_v12 = vld [vmem:[%s548_s3 + $0x10] sm:$0xff]   ;;  %v412_v13 = vld [vmem:[%s548_s3 + $0x8] sm:$0xff]  }
   0x5   :  { %v413_v14 = vld [vmem:[%s548_s3] sm:$0xff]   ;;  %v414_v15 = vld [vmem:[%s550_s5 + $0x18] sm:$0xff]   ;;  %v415_v16 = vld [vmem:[%s550_s5 + $0x10] sm:$0xff]  }
   0x6   :  { %v316_v17 = vld [vmem:[%s551_s2] ss:$0 sm:$0xff]  ;;  %v416_v25 = vld [vmem:[%s550_s5 + $0x8] sm:$0xff]  }
   0x7   :  { %359 = vmatpush3.bf16.msra.mxu0 %v403_v2  ;;  %371 = vmatpush3.bf16.msra.mxu1 %v407_v5  ;;  %v417_v26 = vld [vmem:[%s550_s5] sm:$0xff]  }
   0x8   :  { %360 = vmatprep.subr.bf16.mxu0 %v418_v0  ;;  %372 = vmatprep.subr.bf16.mxu1 %v418_v0  ;;  %v322_v27 = vld [vmem:[%s552_s4] ss:$0 sm:$0xff] }
   0x9   :  { %v331_v35 = vld [vmem:[%s553_s6] ss:$0 sm:$0xff] }
   0xb   :  { %361 = vmatpush3.bf16.msra.mxu0 %v404_v4  ;;  %373 = vmatpush3.bf16.msra.mxu1 %v408_v8 }
   0xc   :  { %362 = vmatprep.subr.bf16.mxu0 %v418_v0  ;;  %374 = vmatprep.subr.bf16.mxu1 %v418_v0 }
   0xf   :  { %363 = vmatpush3.bf16.msra.mxu0 %v405_v6  ;;  %375 = vmatpush3.bf16.msra.mxu1 %v409_v10 }
  0x10   :  { %388 = vmatprep.subr.bf16.mxu0 %v418_v0  ;;  %376 = vmatprep.subr.bf16.mxu1 %v418_v0 }
  0x12   :  { %365 = vmatmul.mubr.msk.bf16.vlgmr.msra.gmra.mxu0 %vm68_vm1, %v37_v9 }
  0x13   :  { %396 = vmatprep.mubr.msk.bf16.mxu0 %vm419_vm0, %v418_v0  ;;  %377 = vmatpush3.bf16.msra.mxu1 %v410_v11 }
  0x14   :  { %378 = vmatprep.subr.bf16.mxu1 %v418_v0  ;;  %389 = vmatpush3.bf16.msra.mxu0 %v414_v15 }
  0x15   :  { %390 = vmatprep.subr.bf16.mxu0 %v418_v0 }
  0x17   :  { %379 = vmatpush3.bf16.msra.mxu1 %v411_v12 }
  0x18   :  { %380 = vmatprep.subr.bf16.mxu1 %v418_v0  ;;  %391 = vmatpush3.bf16.msra.mxu0 %v415_v16 }
  0x19   :  { %392 = vmatprep.subr.bf16.mxu0 %v418_v0 }
  0x1b   :  { %381 = vmatpush3.bf16.msra.mxu1 %v412_v13 }
  0x1c   :  { %382 = vmatprep.subr.bf16.mxu1 %v418_v0  ;;  %393 = vmatpush3.bf16.msra.mxu0 %v416_v25 }
  0x1d   :  { %394 = vmatprep.subr.bf16.mxu0 %v418_v0 }
  0x1f   :  { %383 = vmatpush3.bf16.msra.mxu1 %v413_v14 }
  0x20   :  { %395 = vmatpush3.bf16.msra.mxu0 %v417_v26 }
  0xd2   :  { %v106_v18 = vpop.f32.mrf.mxu0 }
  0xd3   :  { %v107_v19 = vadd.f32 %v316_v17, %v106_v18 }
  0xd4   :  { %v366_v20 = vpop.f32.mrf.mxu0 }
  0xd5   :  { %v112_v21 = vmax.f32 %v107_v19, 0.0 }
  0xd6   :  { %v109_v22 = vpop.f32.mrf.mxu0 }
  0xd7   :  { %v130_v23 = vpack.c.bf16 %v112_v21, %v112_v21 }
  0xd8   :  { %v367_v24 = vpop.f32.mrf.mxu0 }
  0xd9   :  { %385 = vmatmul.mubr.bf16.vlgmr.msra.gmra.mxu1 %v130_v23 }
 0x199   :  { %v219_v28 = vpop.f32.mrf.mxu1 }
 0x19a   :  { %v220_v29 = vadd.f32 %v322_v27, %v219_v28 }
 0x19b   :  { %v386_v30 = vpop.f32.mrf.mxu1 }
 0x19c   :  { %v225_v31 = vmax.f32 %v220_v29, 0.0 }
 0x19d   :  { %v222_v32 = vpop.f32.mrf.mxu1 }
 0x19e   :  { %v235_v33 = vpack.c.bf16 %v225_v31, %v225_v31 }
 0x19f   :  { %v387_v34 = vpop.f32.mrf.mxu1 }
 0x1a0   :  { %397 = vmatmul.mubr.msk.bf16.vlgmr.msra.gmra.mxu0 %vm68_vm1, %v235_v33 }
 0x260   :  { %v303_v36 = vpop.f32.mrf.mxu0 }
 0x261   :  { %v304_v37 = vadd.f32 %v331_v35, %v303_v36 }
 0x262   :  { %v398_v38 = vpop.f32.mrf.mxu0 }
 0x263   :  { %v309_v39 = vmax.f32 %v304_v37, 0.0 }
 0x264   :  { %v306_v40 = vpop.f32.mrf.mxu0 }
 0x265   :  { %v310_v41 = vadd.f32 %v309_v39, %v112_v21 }
 0x266   :  { %v399_v42 = vpop.f32.mrf.mxu0 }
 0x267   :  { %311 = vst [vmem:[%s554_s7] sm:$0xff] %v310_v41 }

// kernel: nets_forward.5
= control target key start
LH: loop header
LB: loop body
LE: loop exit
PB: predicated region body
PF: predicated region fallthrough
CT: control target
= control target key end

     0   :  { %s722_s18 = smov 0   ;;  %s786_s0 = inlined_call_operand.vmem [shape: f32[128,3], index: 0, kind: input, shape index: {}]   ;;  %s787_s1 = inlined_call_operand.vmem [shape: f32[3,3], index: 1, kind: input, shape index: {}]   ;;  %s788_s2 = inlined_call_operand.vmem [shape: f32[1,3], index: 2, kind: input, shape index: {}]   ;;  %s789_s3 = inlined_call_operand.vmem [shape: f32[3,32], index: 3, kind: input, shape index: {}]   ;;  %s790_s4 = inlined_call_operand.vmem [shape: f32[1,32], index: 4, kind: input, shape index: {}]   ;;  %s791_s5 = inlined_call_operand.vmem [shape: f32[128,32], index: 5, kind: output, shape index: {}]  }
   0x1 LB: > { %s599_s19 = sadd.s32 4294967295, %s690_s18   ;;  %p603_p0 = scmp.ge.s32.totalorder %s690_s18, 1  ;;  %s690_s18 = sphi %s722_s18, %s15_s18  }
   0x2   : > { %p188_p1 = scmp.lt.s32.totalorder %s690_s18, 3 }
   0x4   : > { %p189_p2 = pnand %p603_p0, %p188_p1 }
   0x5   : > { %s604_s22 = sshll.u32 (!%p189_p2), %s599_s19, 3 }
   0x6   : > { %192 = sbr.rel (%p189_p2) target bundleno = 428 (0x1ac), region = 40  ;;  %p217_p3 = scmp.lt.s32.totalorder (!%p189_p2), %s604_s22, 15 }
   0xb   : > { %v236_v0 = vld [vmem:[%s787_s1] sm:$0x7]  ;;  %vm269_vm0 = vcmask 1042432   ;;  %s793_s22 = smov (!%p217_p3, %s604_s22), 15  ;;  %vm244_vm1 = vcmask 23552   ;;  %vm534_vm2 = vcmask 261120  }
   0xc   : > { %648 = vmatprep.subr.msk.mxu0 %vm269_vm0, %v236_v0  ;;  %s605_s23 = sshll.u32 %s793_s22, 3  ;;  %v394_v9 = vld [vmem:[%s789_s3] sm:$0x7] }
   0xd   : > { %649 = vmatpush3.msk.msra.mxu0 %vm269_vm0, %v236_v0  ;;  %s220_s26 = scalar_lea.vmem %s786_s0, %s605_s23  ;;  %662 = vmatprep.subr.msk.mxu1 %vm269_vm0, %v394_v9  ;;  %v608_v10 = vld [vmem:[%s788_s2] ss:$0 sm:$0xff]  ;;  %s226_s10 = scalar_lea.vmem %s791_s5, %s605_s23 }
   0xe   : > { %v228_v1 = vld [vmem:[%s220_s26] sm:$0xff]  ;;  %v229_v2 = vld [vmem:[%s220_s26 + $0x8] sm:$0xff]  ;;  %v230_v3 = vld [vmem:[%s220_s26 + $0x10] sm:$0xff]  ;;  %663 = vmatpush3.msk.msra.mxu1 %vm269_vm0, %v394_v9 }
   0xf   : > { %650 = vmatprep.mubr.msk.f32.mxu0 %vm244_vm1, %v228_v1  ;;  %v231_v4 = vld [vmem:[%s220_s26 + $0x18] sm:$0xff]  ;;  %v232_v5 = vld [vmem:[%s220_s26 + $0x20] sm:$0xff]  ;;  %v233_v6 = vld [vmem:[%s220_s26 + $0x28] sm:$0xff] }
  0x10   : > { %651 = vmatmul.mubr.msk.f32.vlgmr.msra.gmra.mxu0 %vm244_vm1, %v229_v2  ;;  %v234_v7 = vld [vmem:[%s220_s26 + $0x30] sm:$0xff]  ;;  %v235_v8 = vld [vmem:[%s220_s26 + $0x38] sm:$0xff]  ;;  %v618_v43 = vld [vmem:[%s790_s4] ss:$0 sm:$0xff] }
  0x11   : > { %653 = vmatprep.mubr.msk.f32.mxu0 %vm244_vm1, %v230_v3 }
  0x14   : > { %654 = vmatmul.mubr.msk.f32.gmra.mxu0 %vm244_vm1, %v231_v4 }
  0x15   : > { %656 = vmatprep.mubr.msk.f32.mxu0 %vm244_vm1, %v232_v5 }
  0x18   : > { %657 = vmatmul.mubr.msk.f32.gmra.mxu0 %vm244_vm1, %v233_v6 }
  0x19   : > { %659 = vmatprep.mubr.msk.f32.mxu0 %vm244_vm1, %v234_v7 }
  0x1c   : > { %660 = vmatmul.mubr.msk.f32.gmra.mxu0 %vm244_vm1, %v235_v8 }
  0xd0   : > { %v652_v11 = vpop.f32.mrf.mxu0 }
  0xd1   : > { %v345_v12 = vadd.f32 %v652_v11, %v608_v10 }
  0xd2   : > { %v339_v13 = vpop.f32.mrf.mxu0 }
  0xd3   : > { %v340_v14 = vadd.f32 %v608_v10, %v339_v13  ;;  %v379_v15 = vmax.f32 %v345_v12, 0.0 }
  0xd4   : > { %v655_v16 = vpop.f32.mrf.mxu0 }
  0xd5   : > { %v378_v17 = vmax.f32 %v340_v14, 0.0  ;;  %v355_v18 = vadd.f32 %v655_v16, %v608_v10  ;;  %v387_v22 = vadd.f32 %v379_v15, %v229_v2 }
  0xd6   : > { %v349_v19 = vpop.f32.mrf.mxu0 }
  0xd7   : > { %v350_v20 = vadd.f32 %v608_v10, %v349_v19  ;;  %v386_v21 = vadd.f32 %v378_v17, %v228_v1  ;;  %v381_v23 = vmax.f32 %v355_v18, 0.0 }
  0xd8   : > { %v658_v24 = vpop.f32.mrf.mxu0 }
  0xd9   : > { %v380_v25 = vmax.f32 %v350_v20, 0.0  ;;  %v365_v26 = vadd.f32 %v658_v24, %v608_v10  ;;  %664 = vmatprep.mubr.msk.f32.mxu1 %vm244_vm1, %v386_v21  ;;  %v389_v30 = vadd.f32 %v381_v23, %v231_v4 }
  0xda   : > { %v359_v27 = vpop.f32.mrf.mxu0  ;;  %665 = vmatmul.mubr.msk.f32.vlgmr.msra.gmra.mxu1 %vm244_vm1, %v387_v22 }
  0xdb   : > { %v388_v28 = vadd.f32 %v380_v25, %v230_v3  ;;  %v360_v29 = vadd.f32 %v608_v10, %v359_v27  ;;  %v383_v31 = vmax.f32 %v365_v26, 0.0 }
  0xdc   : > { %v661_v32 = vpop.f32.mrf.mxu0 }
  0xdd   : > { %v382_v33 = vmax.f32 %v360_v29, 0.0  ;;  %v375_v34 = vadd.f32 %v661_v32, %v608_v10  ;;  %667 = vmatprep.mubr.msk.f32.mxu1 %vm244_vm1, %v388_v28  ;;  %v391_v38 = vadd.f32 %v383_v31, %v233_v6 }
  0xde   : > { %v369_v35 = vpop.f32.mrf.mxu0  ;;  %668 = vmatmul.mubr.msk.f32.gmra.mxu1 %vm244_vm1, %v389_v30 }
  0xdf   : > { %v390_v36 = vadd.f32 %v382_v33, %v232_v5  ;;  %v370_v37 = vadd.f32 %v608_v10, %v369_v35  ;;  %v385_v39 = vmax.f32 %v375_v34, 0.0 }
  0xe1   : > { %v384_v40 = vmax.f32 %v370_v37, 0.0  ;;  %670 = vmatprep.mubr.msk.f32.mxu1 %vm244_vm1, %v390_v36  ;;  %v393_v42 = vadd.f32 %v385_v39, %v235_v8 }
  0xe2   : > { %671 = vmatmul.mubr.msk.f32.gmra.mxu1 %vm244_vm1, %v391_v38 }
  0xe3   : > { %v392_v41 = vadd.f32 %v384_v40, %v234_v7 }
  0xe5   : > { %673 = vmatprep.mubr.msk.f32.mxu1 %vm244_vm1, %v392_v41 }
  0xe6   : > { %674 = vmatmul.mubr.msk.f32.gmra.mxu1 %vm244_vm1, %v393_v42 }
 0x19a   : > { %v666_v44 = vpop.f32.mrf.mxu1 }
 0x19b   : > { %v501_v45 = vadd.f32 %v666_v44, %v618_v43 }
 0x19c   : > { %v495_v46 = vpop.f32.mrf.mxu1 }
 0x19d   : > { %536 = vst.msk [vmem:[%s226_s10 + $0x8] sm:$0xff] %vm534_vm2, %v501_v45  ;;  %v496_v47 = vadd.f32 %v618_v43, %v495_v46 }
 0x19e   : > { %v669_v48 = vpop.f32.mrf.mxu1 }
 0x19f   : > { %535 = vst.msk [vmem:[%s226_s10] sm:$0xff] %vm534_vm2, %v496_v47  ;;  %v511_v49 = vadd.f32 %v669_v48, %v618_v43 }
 0x1a0   : > { %v505_v50 = vpop.f32.mrf.mxu1 }
 0x1a1   : > { %538 = vst.msk [vmem:[%s226_s10 + $0x18] sm:$0xff] %vm534_vm2, %v511_v49  ;;  %v506_v51 = vadd.f32 %v618_v43, %v505_v50 }
 0x1a2   : > { %v672_v52 = vpop.f32.mrf.mxu1 }
 0x1a3   : > { %537 = vst.msk [vmem:[%s226_s10 + $0x10] sm:$0xff] %vm534_vm2, %v506_v51  ;;  %v521_v53 = vadd.f32 %v672_v52, %v618_v43 }
 0x1a4   : > { %v515_v54 = vpop.f32.mrf.mxu1 }
 0x1a5   : > { %540 = vst.msk [vmem:[%s226_s10 + $0x28] sm:$0xff] %vm534_vm2, %v521_v53  ;;  %v516_v55 = vadd.f32 %v618_v43, %v515_v54 }
 0x1a6   : > { %v675_v56 = vpop.f32.mrf.mxu1 }
 0x1a7   : > { %539 = vst.msk [vmem:[%s226_s10 + $0x20] sm:$0xff] %vm534_vm2, %v516_v55  ;;  %v531_v57 = vadd.f32 %v675_v56, %v618_v43 }
 0x1a8   : > { %v525_v58 = vpop.f32.mrf.mxu1 }
 0x1a9   : > { %542 = vst.msk [vmem:[%s226_s10 + $0x38] sm:$0xff] %vm534_vm2, %v531_v57  ;;  %v526_v59 = vadd.f32 %v618_v43, %v525_v58 }
 0x1ab   : > { %541 = vst.msk [vmem:[%s226_s10 + $0x30] sm:$0xff] %vm534_vm2, %v526_v59 }
 0x1ac PF: > { %s15_s18 = sadd.s32 1, %s690_s18  }
 0x1ad   : > { %p12_p4 = scmp.ge.s32.totalorder %s15_s18, 4  }
 0x1af   :  { %14 = sbr.rel (!%p12_p4) target bundleno = 1 (0x1), region = 70 }

// kernel: nets_forward.8
= control target key start
LH: loop header
LB: loop body
LE: loop exit
PB: predicated region body
PF: predicated region fallthrough
CT: control target
= control target key end

     0   :  { %s520_s15 = smov 0   ;;  %s567_s0 = inlined_call_operand.vmem [shape: f32[32,128], index: 0, kind: input, shape index: {}]   ;;  %s568_s1 = inlined_call_operand.vmem [shape: bf16[128,64], index: 1, kind: input, shape index: {}]   ;;  %s569_s2 = inlined_call_operand.vmem [shape: f32[1,64], index: 2, kind: input, shape index: {}]   ;;  %s570_s3 = inlined_call_operand.vmem [shape: f32[32,64], index: 3, kind: input, shape index: {}]   ;;  %s571_s4 = inlined_call_operand.vmem [shape: f32[32,64], index: 4, kind: output, shape index: {}]  }
   0x1 LB: > { %s416_s16 = sadd.s32 4294967295, %s491_s15   ;;  %p420_p0 = scmp.ge.s32.totalorder %s491_s15, 1  ;;  %s491_s15 = sphi %s520_s15, %s14_s15  }
   0x2   : > { %p174_p1 = scmp.lt.s32.totalorder %s491_s15, 3 }
   0x4   : > { %p175_p2 = pnand %p420_p0, %p174_p1 }
   0x5   : > { %s421_s23 = sshll.u32 (!%p175_p2), %s416_s16, 1 }
   0x6   : > { %178 = sbr.rel (%p175_p2) target bundleno = 248 (0xf8), region = 36  ;;  %p206_p3 = scmp.lt.s32.totalorder (!%p175_p2), %s421_s23, 3 }
   0xb   : > { %v477_v0 = vld [vmem:[%s568_s1 + $0x38] sm:$0xff]   ;;  %v493_v1 = vmov 0.0   ;;  %v478_v2 = vld [vmem:[%s568_s1 + $0x30] sm:$0xff]   ;;  %vm494_vm0 = vmmov 0   ;;  %v479_v3 = vld [vmem:[%s568_s1 + $0x28] sm:$0xff]   ;;  %s573_s23 = smov (!%p206_p3, %s421_s23), 3 }
   0xc   : > { %447 = vmatprep.subr.bf16.mxu0 %v493_v1  ;;  %463 = vmatprep.mubr.msk.bf16.mxu0 %vm494_vm0, %v493_v1  ;;  %v480_v4 = vld [vmem:[%s568_s1 + $0x20] sm:$0xff]   ;;  %v481_v5 = vld [vmem:[%s568_s1 + $0x18] sm:$0xff]   ;;  %v482_v6 = vld [vmem:[%s568_s1 + $0x10] sm:$0xff]   ;;  %s422_s30 = sshll.u32 %s573_s23, 3  ;;  %vm345_vm1 = vcmask 523264  }
   0xd   : > { %448 = vmatpush3.bf16.msra.mxu0 %v477_v0  ;;  %v483_v7 = vld [vmem:[%s568_s1 + $0x8] sm:$0xff]   ;;  %s209_s9 = scalar_lea.vmem %s567_s0, %s422_s30  ;;  %v484_v8 = vld [vmem:[%s568_s1] sm:$0xff]   ;;  %s215_s17 = scalar_lea.vmem %s570_s3, %s422_s30 }
   0xe   : > { %449 = vmatprep.subr.bf16.mxu0 %v493_v1  ;;  %v224_v9 = vld [vmem:[%s209_s9] sm:$0xff]  ;;  %v225_v10 = vld [vmem:[%s209_s9 + $0x8] sm:$0xff]  ;;  %s221_s20 = scalar_lea.vmem %s571_s4, %s422_s30 }
   0xf   : > { %v243_v11 = vpack.c.bf16 %v225_v10, %v224_v9  ;;  %v427_v12 = vld [vmem:[%s569_s2] ss:$0 sm:$0xff]  ;;  %v342_v21 = vld [vmem:[%s215_s17 + $0x8] sm:$0xff] }
  0x10   : > { %v341_v15 = vld [vmem:[%s215_s17] sm:$0xff] }
  0x11   : > { %450 = vmatpush3.bf16.msra.mxu0 %v478_v2 }
  0x12   : > { %451 = vmatprep.subr.bf16.mxu0 %v493_v1 }
  0x15   : > { %452 = vmatpush3.bf16.msra.mxu0 %v479_v3 }
  0x16   : > { %453 = vmatprep.subr.bf16.mxu0 %v493_v1 }
  0x19   : > { %454 = vmatpush3.bf16.msra.mxu0 %v480_v4 }
  0x1a   : > { %455 = vmatprep.subr.bf16.mxu0 %v493_v1 }
  0x1d   : > { %456 = vmatpush3.bf16.msra.mxu0 %v481_v5 }
  0x1e   : > { %457 = vmatprep.subr.bf16.mxu0 %v493_v1 }
  0x21   : > { %458 = vmatpush3.bf16.msra.mxu0 %v482_v6 }
  0x22   : > { %459 = vmatprep.subr.bf16.mxu0 %v493_v1 }
  0x25   : > { %460 = vmatpush3.bf16.msra.mxu0 %v483_v7 }
  0x26   : > { %461 = vmatprep.subr.bf16.mxu0 %v493_v1 }
  0x29   : > { %462 = vmatpush3.bf16.msra.mxu0 %v484_v8 }
  0x2c   : > { %464 = vmatmul.mubr.bf16.vlgmr.msra.gmra.mxu0 %v243_v11 }
  0xec   : > { %v332_v13 = vpop.f32.mrf.mxu0 }
  0xed   : > { %v333_v14 = vadd.f32 %v427_v12, %v332_v13 }
  0xee   : > { %v465_v16 = vpop.f32.mrf.mxu0 }
  0xef   : > { %v339_v17 = vmax.f32 %v333_v14, 0.0 }
  0xf0   : > { %v335_v18 = vpop.f32.mrf.mxu0 }
  0xf1   : > { %v343_v19 = vadd.f32 %v341_v15, %v339_v17  ;;  %v336_v20 = vadd.f32 %v427_v12, %v335_v18 }
  0xf2   : > { %v466_v22 = vpop.f32.mrf.mxu0 }
  0xf3   : > { %346 = vst.msk [vmem:[%s221_s20] sm:$0xff] %vm345_vm1, %v343_v19  ;;  %v340_v23 = vmax.f32 %v336_v20, 0.0 }
  0xf5   : > { %v344_v24 = vadd.f32 %v342_v21, %v340_v23 }
  0xf7   : > { %347 = vst.msk [vmem:[%s221_s20 + $0x8] sm:$0xff] %vm345_vm1, %v344_v24 }
  0xf8 PF: > { %s14_s15 = sadd.s32 1, %s491_s15  }
  0xf9   : > { %p11_p4 = scmp.ge.s32.totalorder %s14_s15, 4  }
  0xfb   :  { %13 = sbr.rel (!%p11_p4) target bundleno = 1 (0x1), region = 69 }

// kernel: nets_forward.9
= control target key start
LH: loop header
LB: loop body
LE: loop exit
PB: predicated region body
PF: predicated region fallthrough
CT: control target
= control target key end

     0   :  { %s951_s27 = smov 0   ;;  %s1031_s0 = inlined_call_operand.vmem [shape: f32[128,64], index: 0, kind: input, shape index: {}]   ;;  %s1032_s1 = inlined_call_operand.vmem [shape: bf16[64,32], index: 1, kind: input, shape index: {}]   ;;  %s1033_s2 = inlined_call_operand.vmem [shape: f32[1,32], index: 2, kind: input, shape index: {}]   ;;  %s1034_s3 = inlined_call_operand.vmem [shape: bf16[32,32], index: 3, kind: input, shape index: {}]   ;;  %s1035_s4 = inlined_call_operand.vmem [shape: f32[1,32], index: 4, kind: input, shape index: {}]   ;;  %s1036_s5 = inlined_call_operand.vmem [shape: bf16[32,128], index: 5, kind: input, shape index: {}]   ;;  %s1037_s6 = inlined_call_operand.vmem [shape: f32[1,128], index: 6, kind: input, shape index: {}]   ;;  %s1038_s7 = inlined_call_operand.vmem [shape: f32[128,32], index: 7, kind: input, shape index: {}]   ;;  %s1039_s8 = inlined_call_operand.vmem [shape: f32[128,128], index: 8, kind: output, shape index: {}]  }
   0x1 LB: > { %s786_s28 = sadd.s32 4294967295, %s904_s27   ;;  %p790_p0 = scmp.ge.s32.totalorder %s904_s27, 1  ;;  %s904_s27 = sphi %s951_s27, %s18_s27  }
   0x2   : > { %p274_p1 = scmp.lt.s32.totalorder %s904_s27, 3 }
   0x4   : > { %p275_p2 = pnand %p790_p0, %p274_p1 }
   0x5   : > { %s791_s9 = sshll.u32 (!%p275_p2), %s786_s28, 3 }
   0x6   : > { %278 = sbr.rel (%p275_p2) target bundleno = 654 (0x28e), region = 52  ;;  %p314_p3 = scmp.lt.s32.totalorder (!%p275_p2), %s791_s9, 15 }
   0xb   : > { %v890_v0 = vld [vmem:[%s1032_s1 + $0x18] sm:$0xff]   ;;  %v891_v1 = vld [vmem:[%s1032_s1 + $0x10] sm:$0xff]   ;;  %v892_v2 = vld [vmem:[%s1032_s1 + $0x8] sm:$0xff]   ;;  %s1041_s9 = smov (!%p314_p3, %s791_s9), 15  ;;  %vm383_vm0 = vcmask 523264   ;;  %vm512_vm1 = vcmask 261120  }
   0xc   : > { %842 = vmatprep.subr.bf16.mxu0 %v890_v0  ;;  %s968_s14 = sshll.u32 %s1041_s9, 3  ;;  %v893_v5 = vld [vmem:[%s1032_s1] sm:$0xff]   ;;  %v894_v16 = vld [vmem:[%s1034_s3 + $0x8] sm:$0xff]  }
   0xd   : > { %843 = vmatpush3.bf16.msra.mxu0 %v890_v0  ;;  %s317_s17 = scalar_lea.vmem %s1031_s0, %s968_s14  ;;  %858 = vmatprep.subr.bf16.mxu1 %v894_v16  ;;  %v895_v17 = vld [vmem:[%s1034_s3] sm:$0xff]   ;;  %v896_v18 = vld [vmem:[%s1036_s5 + $0x8] sm:$0xff]   ;;  %s997_s9 = scalar_lea.vmem %s1038_s7, %s968_s14 }
   0xe   : > { %844 = vmatprep.subr.bf16.mxu0 %v891_v1  ;;  %v332_v3 = vld [vmem:[%s317_s17] sm:$0xff]  ;;  %v333_v4 = vld [vmem:[%s317_s17 + $0x8] sm:$0xff]  ;;  %v334_v7 = vld [vmem:[%s317_s17 + $0x10] sm:$0xff]  ;;  %859 = vmatpush3.bf16.msra.mxu1 %v894_v16  ;;  %s329_s19 = scalar_lea.vmem %s1039_s8, %s968_s14 }
   0xf   : > { %v349_v6 = vpack.c.bf16 %v333_v4, %v332_v3  ;;  %v335_v8 = vld [vmem:[%s317_s17 + $0x18] sm:$0xff]  ;;  %v336_v9 = vld [vmem:[%s317_s17 + $0x20] sm:$0xff]  ;;  %v337_v10 = vld [vmem:[%s317_s17 + $0x28] sm:$0xff]  ;;  %860 = vmatprep.subr.bf16.mxu1 %v895_v17 }
  0x10   : > { %v350_v11 = vpack.c.bf16 %v335_v8, %v334_v7  ;;  %v351_v12 = vpack.c.bf16 %v337_v10, %v336_v9  ;;  %v338_v13 = vld [vmem:[%s317_s17 + $0x30] sm:$0xff]  ;;  %v339_v14 = vld [vmem:[%s317_s17 + $0x38] sm:$0xff]  ;;  %v797_v20 = vld [vmem:[%s1033_s2] ss:$0 sm:$0xff] }
  0x11   : > { %845 = vmatpush3.bf16.msra.mxu0 %v891_v1  ;;  %850 = vmatprep.mubr.msk.bf16.mxu0 %vm383_vm0, %v349_v6  ;;  %v352_v15 = vpack.c.bf16 %v339_v14, %v338_v13  ;;  %v472_v29 = vld [vmem:[%s997_s9 + $0x18] sm:$0xff]  ;;  %v469_v32 = vld [vmem:[%s997_s9] sm:$0xff]  ;;  %v470_v33 = vld [vmem:[%s997_s9 + $0x8] sm:$0xff] }
  0x12   : > { %846 = vmatprep.subr.bf16.mxu0 %v892_v2  ;;  %861 = vmatpush3.bf16.msra.mxu1 %v895_v17  ;;  %v471_v35 = vld [vmem:[%s997_s9 + $0x10] sm:$0xff]  ;;  %v476_v51 = vld [vmem:[%s997_s9 + $0x38] sm:$0xff]  ;;  %v473_v54 = vld [vmem:[%s997_s9 + $0x20] sm:$0xff] }
  0x13   : > { %870 = vmatprep.subr.bf16.mxu1 %v896_v18  ;;  %v474_v55 = vld [vmem:[%s997_s9 + $0x28] sm:$0xff]  ;;  %v475_v56 = vld [vmem:[%s997_s9 + $0x30] sm:$0xff]  ;;  %v897_v0 = vld [vmem:[%s1036_s5] sm:$0xff]  }
  0x15   : > { %847 = vmatpush3.bf16.msra.mxu0 %v892_v2  ;;  %v806_v2 = vld [vmem:[%s1035_s4] ss:$0 sm:$0xff] }
  0x16   : > { %848 = vmatprep.subr.bf16.mxu0 %v893_v5 }
  0x19   : > { %849 = vmatpush3.bf16.msra.mxu0 %v893_v5 }
  0x1c   : > { %851 = vmatmul.mubr.msk.bf16.vlgmr.msra.gmra.mxu0 %vm383_vm0, %v350_v11 }
  0x1d   : > { %854 = vmatprep.mubr.msk.bf16.mxu0 %vm383_vm0, %v351_v12 }
  0x24   : > { %855 = vmatmul.mubr.msk.bf16.gmra.mxu0 %vm383_vm0, %v352_v15 }
  0xdc   : > { %v852_v19 = vpop.f32.mrf.mxu0 }
  0xdd   : > { %v439_v23 = vadd.f32 %v852_v19, %v797_v20 }
  0xde   : > { %v430_v21 = vpop.f32.mrf.mxu0 }
  0xdf   : > { %v431_v22 = vadd.f32 %v797_v20, %v430_v21  ;;  %v463_v31 = vmax.f32 %v439_v23, 0.0 }
  0xe0   : > { %v853_v24 = vpop.f32.mrf.mxu0 }
  0xe1   : > { %v442_v25 = vadd.f32 %v853_v24, %v797_v20  ;;  %v461_v27 = vmax.f32 %v431_v22, 0.0  ;;  %v479_v42 = vadd.f32 %v471_v35, %v463_v31 }
  0xe2   : > { %v433_v26 = vpop.f32.mrf.mxu0 }
  0xe3   : > { %v464_v28 = vmax.f32 %v442_v25, 0.0  ;;  %v434_v30 = vadd.f32 %v797_v20, %v433_v26  ;;  %v477_v39 = vadd.f32 %v469_v32, %v461_v27 }
  0xe4   : > { %v856_v34 = vpop.f32.mrf.mxu0 }
  0xe5   : > { %v462_v36 = vmax.f32 %v434_v30, 0.0  ;;  %v480_v37 = vadd.f32 %v472_v29, %v464_v28  ;;  %v455_v43 = vadd.f32 %v856_v34, %v797_v20 }
  0xe6   : > { %v446_v38 = vpop.f32.mrf.mxu0 }
  0xe7   : > { %v478_v40 = vadd.f32 %v470_v33, %v462_v36  ;;  %v447_v41 = vadd.f32 %v797_v20, %v446_v38  ;;  %v491_v47 = vpack.c.bf16 %v480_v37, %v479_v42  ;;  %v467_v53 = vmax.f32 %v455_v43, 0.0  ;;  %v813_v38 = vld [vmem:[%s1037_s6] ss:$0 sm:$0xff] }
  0xe8   : > { %v857_v44 = vpop.f32.mrf.mxu0 }
  0xe9   : > { %v458_v45 = vadd.f32 %v857_v44, %v797_v20  ;;  %v490_v46 = vpack.c.bf16 %v478_v40, %v477_v39  ;;  %v465_v49 = vmax.f32 %v447_v41, 0.0  ;;  %v483_v61 = vadd.f32 %v475_v56, %v467_v53 }
  0xea   : > { %v449_v48 = vpop.f32.mrf.mxu0 }
  0xeb   : > { %v468_v50 = vmax.f32 %v458_v45, 0.0  ;;  %v450_v52 = vadd.f32 %v797_v20, %v449_v48  ;;  %862 = vmatprep.mubr.msk.bf16.mxu1 %vm512_vm1, %v490_v46  ;;  %v481_v59 = vadd.f32 %v473_v54, %v465_v49 }
  0xec   : > { %863 = vmatmul.mubr.msk.bf16.vlgmr.msra.gmra.mxu1 %vm512_vm1, %v491_v47 }
  0xed   : > { %v466_v57 = vmax.f32 %v450_v52, 0.0  ;;  %871 = vmatpush3.bf16.msra.mxu1 %v896_v18  ;;  %v484_v58 = vadd.f32 %v476_v51, %v468_v50 }
  0xee   : > { %872 = vmatprep.subr.bf16.mxu1 %v897_v0 }
  0xef   : > { %v482_v60 = vadd.f32 %v474_v55, %v466_v57  ;;  %v493_v63 = vpack.c.bf16 %v484_v58, %v483_v61 }
  0xf1   : > { %v492_v62 = vpack.c.bf16 %v482_v60, %v481_v59  ;;  %873 = vmatpush3.bf16.msra.mxu1 %v897_v0 }
  0xf3   : > { %866 = vmatprep.mubr.msk.bf16.mxu1 %vm512_vm1, %v492_v62 }
  0xf4   : > { %867 = vmatmul.mubr.msk.bf16.gmra.mxu1 %vm512_vm1, %v493_v63 }
 0x1ac   : > { %v864_v1 = vpop.f32.mrf.mxu1 }
 0x1ad   : > { %v568_v5 = vadd.f32 %v864_v1, %v806_v2 }
 0x1ae   : > { %v559_v3 = vpop.f32.mrf.mxu1 }
 0x1af   : > { %v560_v4 = vadd.f32 %v806_v2, %v559_v3  ;;  %v592_v12 = vmax.f32 %v568_v5, 0.0 }
 0x1b0   : > { %v865_v6 = vpop.f32.mrf.mxu1 }
 0x1b1   : > { %v571_v7 = vadd.f32 %v865_v6, %v806_v2  ;;  %v590_v9 = vmax.f32 %v560_v4, 0.0  ;;  %v600_v20 = vadd.f32 %v592_v12, %v479_v42 }
 0x1b2   : > { %v562_v8 = vpop.f32.mrf.mxu1 }
 0x1b3   : > { %v593_v10 = vmax.f32 %v571_v7, 0.0  ;;  %v563_v11 = vadd.f32 %v806_v2, %v562_v8  ;;  %v598_v17 = vadd.f32 %v590_v9, %v477_v39 }
 0x1b4   : > { %v868_v13 = vpop.f32.mrf.mxu1 }
 0x1b5   : > { %v591_v14 = vmax.f32 %v563_v11, 0.0  ;;  %v601_v15 = vadd.f32 %v593_v10, %v480_v37  ;;  %v584_v21 = vadd.f32 %v868_v13, %v806_v2 }
 0x1b6   : > { %v575_v16 = vpop.f32.mrf.mxu1 }
 0x1b7   : > { %v599_v18 = vadd.f32 %v591_v14, %v478_v40  ;;  %v576_v19 = vadd.f32 %v806_v2, %v575_v16  ;;  %v612_v25 = vpack.c.bf16 %v601_v15, %v600_v20  ;;  %v596_v30 = vmax.f32 %v584_v21, 0.0 }
 0x1b8   : > { %v869_v22 = vpop.f32.mrf.mxu1 }
 0x1b9   : > { %v611_v23 = vpack.c.bf16 %v599_v18, %v598_v17  ;;  %v587_v24 = vadd.f32 %v869_v22, %v806_v2  ;;  %v594_v27 = vmax.f32 %v576_v19, 0.0  ;;  %v604_v35 = vadd.f32 %v596_v30, %v483_v61 }
 0x1ba   : > { %v578_v26 = vpop.f32.mrf.mxu1 }
 0x1bb   : > { %v597_v28 = vmax.f32 %v587_v24, 0.0  ;;  %v579_v29 = vadd.f32 %v806_v2, %v578_v26  ;;  %874 = vmatprep.mubr.msk.bf16.mxu1 %vm512_vm1, %v611_v23  ;;  %v602_v33 = vadd.f32 %v594_v27, %v481_v59 }
 0x1bc   : > { %875 = vmatmul.mubr.msk.bf16.vlgmr.msra.gmra.mxu1 %vm512_vm1, %v612_v25 }
 0x1bd   : > { %v595_v31 = vmax.f32 %v579_v29, 0.0  ;;  %v605_v32 = vadd.f32 %v597_v28, %v484_v58 }
 0x1bf   : > { %v603_v34 = vadd.f32 %v595_v31, %v482_v60  ;;  %v614_v37 = vpack.c.bf16 %v605_v32, %v604_v35 }
 0x1c1   : > { %v613_v36 = vpack.c.bf16 %v603_v34, %v602_v33 }
 0x1c3   : > { %878 = vmatprep.mubr.msk.bf16.mxu1 %vm512_vm1, %v613_v36 }
 0x1c4   : > { %879 = vmatmul.mubr.msk.bf16.gmra.mxu1 %vm512_vm1, %v614_v37 }
 0x27c   : > { %v876_v39 = vpop.f32.mrf.mxu1 }
 0x27d   : > { %v688_v40 = vadd.f32 %v876_v39, %v813_v38 }
 0x27e   : > { %v679_v41 = vpop.f32.mrf.mxu1 }
 0x27f   : > { %712 = vst [vmem:[%s329_s19 + $0x10] sm:$0xff] %v688_v40  ;;  %v680_v42 = vadd.f32 %v813_v38, %v679_v41 }
 0x280   : > { %v877_v43 = vpop.f32.mrf.mxu1 }
 0x281   : > { %710 = vst [vmem:[%s329_s19] sm:$0xff] %v680_v42  ;;  %v691_v44 = vadd.f32 %v877_v43, %v813_v38 }
 0x282   : > { %v682_v45 = vpop.f32.mrf.mxu1 }
 0x283   : > { %713 = vst [vmem:[%s329_s19 + $0x18] sm:$0xff] %v691_v44  ;;  %v683_v46 = vadd.f32 %v813_v38, %v682_v45 }
 0x284   : > { %v880_v47 = vpop.f32.mrf.mxu1 }
 0x285   : > { %711 = vst [vmem:[%s329_s19 + $0x8] sm:$0xff] %v683_v46  ;;  %v704_v48 = vadd.f32 %v880_v47, %v813_v38 }
 0x286   : > { %v695_v49 = vpop.f32.mrf.mxu1 }
 0x287   : > { %716 = vst [vmem:[%s329_s19 + $0x30] sm:$0xff] %v704_v48  ;;  %v696_v50 = vadd.f32 %v813_v38, %v695_v49 }
 0x288   : > { %v881_v51 = vpop.f32.mrf.mxu1 }
 0x289   : > { %714 = vst [vmem:[%s329_s19 + $0x20] sm:$0xff] %v696_v50  ;;  %v707_v52 = vadd.f32 %v881_v51, %v813_v38 }
 0x28a   : > { %v698_v53 = vpop.f32.mrf.mxu1 }
 0x28b   : > { %717 = vst [vmem:[%s329_s19 + $0x38] sm:$0xff] %v707_v52  ;;  %v699_v54 = vadd.f32 %v813_v38, %v698_v53 }
 0x28d   : > { %715 = vst [vmem:[%s329_s19 + $0x28] sm:$0xff] %v699_v54 }
 0x28e PF: > { %s18_s27 = sadd.s32 1, %s904_s27  }
 0x28f   : > { %p15_p4 = scmp.ge.s32.totalorder %s18_s27, 4  }
 0x291   :  { %17 = sbr.rel (!%p15_p4) target bundleno = 1 (0x1), region = 85 }

</bundles_post_ra>
